<compile_context>
chip_gen: v5e
topology: v5e:2x2
jax: 0.10.0
libtpu: 0.0.40
codegen_flags: <defaults>
</compile_context>

<pallas_src>
import functools

import jax
import jax.numpy as jnp
from jax import lax
from jax.experimental import pallas as pl
from jax.experimental.pallas import tpu as pltpu


def _round_up(v, m):
    return pl.cdiv(v, m) * m


def _prenormdrop_kernel(x_ref,               # (tm, D)  input rows
                        gamma_ref, beta_ref, # (1, D)   LayerNorm affine (f32)
                        w_ref,               # (D, D)   Linear weight (bf16)
                        b_ref,               # (1, D)   Linear bias (f32)
                        mask_ref,            # (tm, D)  pre-scaled dropout mask
                        o_ref,               # (tm, D)  output rows
                        *, eps):
    x = x_ref[...].astype(jnp.float32)

    # ---- LayerNorm over the last (hidden) dim ----
    mean = jnp.mean(x, axis=-1, keepdims=True)
    xc = x - mean
    var = jnp.mean(xc * xc, axis=-1, keepdims=True)
    xhat = xc * lax.rsqrt(var + eps)
    y = xhat * gamma_ref[...] + beta_ref[...]          # params already f32

    # ---- fn: Linear(dim, dim) -- bf16 MXU matmul, f32 accumulation ----
    z = jnp.dot(y.astype(jnp.bfloat16), w_ref[...],
                preferred_element_type=jnp.float32)
    z = z + b_ref[...]

    # ---- Dropout: multiply by pre-scaled keep mask (0 or 1/(1-p)) ----
    z = z * mask_ref[...].astype(jnp.float32)

    o_ref[...] = z.astype(o_ref.dtype)


def prenormdrop(x, gamma, beta, w, b, *, dropout_rate, dropout_key,
                eps=1e-5, tm=256):
    """x: [B, N, D] -> [B, N, D]. Training-mode dropout semantics."""
    B, N, D = x.shape
    rows = B * N
    p = float(dropout_rate)

    # Row-tile selection: multiple of 8 (f32 sublanes), as large as the data /
    # a conservative VMEM budget allows.
    tm = max(8, min(int(tm), _round_up(rows, 8)))
    tm = _round_up(tm, 8)
    # Keep double-buffered x/mask/out tiles (f32-equivalent) under ~40 MiB.
    while tm > 8 and 2 * tm * D * 3 * 4 > 40 * 1024 * 1024:
        tm = _round_up(tm // 2, 8)
    rows_p = _round_up(rows, tm)

    x2 = x.reshape(rows, D)
    if rows_p != rows:
        x2 = jnp.pad(x2, ((0, rows_p - rows), (0, 0)))

    # Pre-scaled dropout keep mask, computed with the portable JAX PRNG.
    # TODO(synk): an in-kernel pltpu.prng_* path would avoid the mask DMA but
    #             does not lower under the CPU interpret harness.
    if p > 0.0:
        keep = jax.random.bernoulli(dropout_key, 1.0 - p, (rows_p, D))
        mask = keep.astype(x.dtype) * jnp.asarray(1.0 / (1.0 - p), x.dtype)
    else:
        mask = jnp.ones((rows_p, D), x.dtype)

    # Hoisted parameter casts (no per-grid-step casts inside the kernel).
    gamma2 = gamma.reshape(1, D).astype(jnp.float32)
    beta2 = beta.reshape(1, D).astype(jnp.float32)
    b2 = b.reshape(1, D).astype(jnp.float32)
    w_bf16 = w.astype(jnp.bfloat16)     # halves resident W + W DMA bytes

    kernel = functools.partial(_prenormdrop_kernel, eps=float(eps))

    # Explicit VMEM budget: double-buffered x/mask/out tiles + resident W,
    # with ~2x headroom for compute temporaries; clamped below v7x's 64 MiB.
    tile_bytes = tm * D * (x2.dtype.itemsize + mask.dtype.itemsize
                           + x.dtype.itemsize)
    est = 2 * tile_bytes + 2 * D * D * 2 + 8 * D * 4
    vmem_bytes = int(min(max(2 * est + (4 << 20), 8 << 20), 56 << 20))

    out2 = pl.pallas_call(
        kernel,
        out_shape=jax.ShapeDtypeStruct((rows_p, D), x.dtype),
        grid_spec=pltpu.PrefetchScalarGridSpec(
            num_scalar_prefetch=0,
            grid=(rows_p // tm,),
            in_specs=[
                pl.BlockSpec((tm, D), lambda i: (i, 0)),   # x rows
                pl.BlockSpec((1, D), lambda i: (0, 0)),    # gamma
                pl.BlockSpec((1, D), lambda i: (0, 0)),    # beta
                pl.BlockSpec((D, D), lambda i: (0, 0)),    # W (bf16, resident)
                pl.BlockSpec((1, D), lambda i: (0, 0)),    # bias
                pl.BlockSpec((tm, D), lambda i: (i, 0)),   # dropout mask
            ],
            out_specs=pl.BlockSpec((tm, D), lambda i: (i, 0)),
        ),
        compiler_params=pltpu.CompilerParams(
            dimension_semantics=("parallel",),   # row tiles are independent
            vmem_limit_bytes=vmem_bytes,
        ),
    )(x2, gamma2, beta2, w_bf16, b2, mask)

    if rows_p != rows:
        out2 = out2[:rows]
    return out2.reshape(B, N, D)


if __name__ == "__main__":
    B, N, D = 2, 8, 32          # batch, seq, hidden (dim)
    dropout_rate = 0.1

    key = jax.random.PRNGKey(0)
    kx, kw, kd = jax.random.split(key, 3)

    x = jax.random.normal(kx, (B, N, D), dtype=jnp.float32)

    # Deterministic parameter init.
    # LayerNorm: gamma = 1, beta = 0 (PyTorch default).
    gamma = jnp.ones((D,), dtype=jnp.float32)
    beta = jnp.zeros((D,), dtype=jnp.float32)
    # fn = Linear(D, D): xavier-uniform-like weights, zero bias.
    limit = (6.0 / (D + D)) ** 0.5
    w = jax.random.uniform(kw, (D, D), dtype=jnp.float32, minval=-limit, maxval=limit)
    b = jnp.zeros((D,), dtype=jnp.float32)

    out = prenormdrop(x, gamma, beta, w, b,
                      dropout_rate=dropout_rate, dropout_key=kd)
    jax.block_until_ready(out)

    assert out.shape == (B, N, D) and out.dtype == x.dtype
    print("KERNEL_OK")
</pallas_src>

<mosaic_0001>
module attributes {stable_mosaic.version = 11 : i64} {
  func.func @_prenormdrop_kernel(%arg0: i32, %arg1: memref<16x32xf32, #tpu.memory_space<vmem>>, %arg2: memref<1x32xf32, #tpu.memory_space<vmem>>, %arg3: memref<1x32xf32, #tpu.memory_space<vmem>>, %arg4: memref<32x32xbf16, #tpu.memory_space<vmem>>, %arg5: memref<1x32xf32, #tpu.memory_space<vmem>>, %arg6: memref<16x32xf32, #tpu.memory_space<vmem>>, %arg7: memref<16x32xf32, #tpu.memory_space<vmem>>) attributes {dimension_semantics = [#tpu.dimension_semantics<parallel>], iteration_bounds = array<i64: 1>, scalar_prefetch = 0 : i64, scratch_operands = 0 : i64, tpu.core_type = #tpu.core_type<tc>, window_params = [{transform_indices = @transform_0, window_bounds = array<i64: 16, 32>}, {pipeline_mode = #tpu.pipeline_mode<synchronous>, transform_indices = @transform_1, window_bounds = array<i64: 1, 32>}, {pipeline_mode = #tpu.pipeline_mode<synchronous>, transform_indices = @transform_2, window_bounds = array<i64: 1, 32>}, {pipeline_mode = #tpu.pipeline_mode<synchronous>, transform_indices = @transform_3, window_bounds = array<i64: 32, 32>}, {pipeline_mode = #tpu.pipeline_mode<synchronous>, transform_indices = @transform_4, window_bounds = array<i64: 1, 32>}, {transform_indices = @transform_5, window_bounds = array<i64: 16, 32>}, {transform_indices = @transform_6, window_bounds = array<i64: 16, 32>}]} {
    %c0 = arith.constant 0 : index
    %c0_0 = arith.constant 0 : index
    %0 = vector.load %arg1[%c0, %c0_0] : memref<16x32xf32, #tpu.memory_space<vmem>>, vector<16x32xf32>
    %cst = arith.constant dense<0.000000e+00> : vector<16xf32>
    %1 = vector.multi_reduction <add>, %0, %cst [1] : vector<16x32xf32> to vector<16xf32>
    %2 = vector.shape_cast %1 : vector<16xf32> to vector<16x1xf32>
    %cst_1 = arith.constant 3.200000e+01 : f32
    %3 = vector.broadcast %cst_1 : f32 to vector<16x1xf32>
    %4 = arith.divf %2, %3 : vector<16x1xf32>
    %5 = vector.broadcast %4 : vector<16x1xf32> to vector<16x32xf32>
    %6 = arith.subf %0, %5 : vector<16x32xf32>
    %7 = arith.mulf %6, %6 : vector<16x32xf32>
    %cst_2 = arith.constant dense<0.000000e+00> : vector<16xf32>
    %8 = vector.multi_reduction <add>, %7, %cst_2 [1] : vector<16x32xf32> to vector<16xf32>
    %9 = vector.shape_cast %8 : vector<16xf32> to vector<16x1xf32>
    %cst_3 = arith.constant 3.200000e+01 : f32
    %10 = vector.broadcast %cst_3 : f32 to vector<16x1xf32>
    %11 = arith.divf %9, %10 : vector<16x1xf32>
    %cst_4 = arith.constant 9.99999974E-6 : f32
    %12 = vector.broadcast %cst_4 : f32 to vector<16x1xf32>
    %13 = arith.addf %11, %12 : vector<16x1xf32>
    %14 = math.rsqrt %13 : vector<16x1xf32>
    %15 = vector.broadcast %14 : vector<16x1xf32> to vector<16x32xf32>
    %16 = arith.mulf %6, %15 : vector<16x32xf32>
    %c0_5 = arith.constant 0 : index
    %c0_6 = arith.constant 0 : index
    %17 = vector.load %arg2[%c0_5, %c0_6] : memref<1x32xf32, #tpu.memory_space<vmem>>, vector<1x32xf32>
    %18 = vector.broadcast %17 : vector<1x32xf32> to vector<16x32xf32>
    %19 = arith.mulf %16, %18 : vector<16x32xf32>
    %c0_7 = arith.constant 0 : index
    %c0_8 = arith.constant 0 : index
    %20 = vector.load %arg3[%c0_7, %c0_8] : memref<1x32xf32, #tpu.memory_space<vmem>>, vector<1x32xf32>
    %21 = vector.broadcast %20 : vector<1x32xf32> to vector<16x32xf32>
    %22 = arith.addf %19, %21 : vector<16x32xf32>
    %23 = arith.truncf %22 : vector<16x32xf32> to vector<16x32xbf16>
    %c0_9 = arith.constant 0 : index
    %c0_10 = arith.constant 0 : index
    %24 = vector.load %arg4[%c0_9, %c0_10] : memref<32x32xbf16, #tpu.memory_space<vmem>>, vector<32x32xbf16>
    %cst_11 = arith.constant dense<0.000000e+00> : vector<16x32xf32>
    %25 = tpu.matmul %23, %24, %cst_11 {dimension_numbers = #tpu.dot_dimension_numbers<[1], [0], [0], [1], [0, 0, 1, 1], [], []>} : vector<16x32xbf16>, vector<32x32xbf16>, vector<16x32xf32> -> vector<16x32xf32>
    %c0_12 = arith.constant 0 : index
    %c0_13 = arith.constant 0 : index
    %26 = vector.load %arg5[%c0_12, %c0_13] : memref<1x32xf32, #tpu.memory_space<vmem>>, vector<1x32xf32>
    %27 = vector.broadcast %26 : vector<1x32xf32> to vector<16x32xf32>
    %28 = arith.addf %25, %27 : vector<16x32xf32>
    %c0_14 = arith.constant 0 : index
    %c0_15 = arith.constant 0 : index
    %29 = vector.load %arg6[%c0_14, %c0_15] : memref<16x32xf32, #tpu.memory_space<vmem>>, vector<16x32xf32>
    %30 = arith.mulf %28, %29 : vector<16x32xf32>
    %c0_16 = arith.constant 0 : index
    %c0_17 = arith.constant 0 : index
    %31 = vector.load %arg7[%c0_16, %c0_17] : memref<16x32xf32, #tpu.memory_space<vmem>>, vector<16x32xf32>
    tpu.vector_store %arg7[%c0_16, %c0_17], %30 {strides = array<i32>} : memref<16x32xf32, #tpu.memory_space<vmem>>, vector<16x32xf32>,
    return
  }
  func.func @transform_0(%arg0: i32) -> (i32, i32) {
    %c0_i32 = arith.constant 0 : i32
    %c0_i32_0 = arith.constant 0 : i32
    return %arg0, %c0_i32 : i32, i32
  }
  func.func @transform_1(%arg0: i32) -> (i32, i32) {
    %c0_i32 = arith.constant 0 : i32
    %c0_i32_0 = arith.constant 0 : i32
    %c0_i32_1 = arith.constant 0 : i32
    return %c0_i32, %c0_i32_0 : i32, i32
  }
  func.func @transform_2(%arg0: i32) -> (i32, i32) {
    %c0_i32 = arith.constant 0 : i32
    %c0_i32_0 = arith.constant 0 : i32
    %c0_i32_1 = arith.constant 0 : i32
    return %c0_i32, %c0_i32_0 : i32, i32
  }
  func.func @transform_3(%arg0: i32) -> (i32, i32) {
    %c0_i32 = arith.constant 0 : i32
    %c0_i32_0 = arith.constant 0 : i32
    %c0_i32_1 = arith.constant 0 : i32
    return %c0_i32, %c0_i32_0 : i32, i32
  }
  func.func @transform_4(%arg0: i32) -> (i32, i32) {
    %c0_i32 = arith.constant 0 : i32
    %c0_i32_0 = arith.constant 0 : i32
    %c0_i32_1 = arith.constant 0 : i32
    return %c0_i32, %c0_i32_0 : i32, i32
  }
  func.func @transform_5(%arg0: i32) -> (i32, i32) {
    %c0_i32 = arith.constant 0 : i32
    %c0_i32_0 = arith.constant 0 : i32
    return %arg0, %c0_i32 : i32, i32
  }
  func.func @transform_6(%arg0: i32) -> (i32, i32) {
    %c0_i32 = arith.constant 0 : i32
    %c0_i32_0 = arith.constant 0 : i32
    return %arg0, %c0_i32 : i32, i32
  }
}

</mosaic_0001>

<bundles_post_ra>
// kernel: tpu_custom_call.1
= control target key start
LH: loop header
LB: loop body
LE: loop exit
PB: predicated region body
PF: predicated region fallthrough
CT: control target
= control target key end

     0   :  { %11 = vsyncpa [#allocation3], 0  ;;  %s457_s0 = inlined_call_operand.hbm [shape: f32[16,32], index: 0, kind: input, shape index: {}]   ;;  %s458_s1 = inlined_call_operand.hbm [shape: f32[1,32], index: 1, kind: input, shape index: {}]   ;;  %s459_s2 = inlined_call_operand.vmem [shape: f32[1,32], index: 2, kind: input, shape index: {}]   ;;  %s460_s3 = inlined_call_operand.hbm [shape: bf16[32,32], index: 3, kind: input, shape index: {}]   ;;  %s461_s4 = inlined_call_operand.vmem [shape: f32[1,32], index: 4, kind: input, shape index: {}]   ;;  %s462_s5 = inlined_call_operand.hbm [shape: f32[16,32], index: 5, kind: input, shape index: {}]   ;;  %s463_s6 = inlined_call_operand.hbm [shape: f32[16,32], index: 6, kind: output, shape index: {}]  }
   0x1   :  { %12 = vsyncpa [#allocation6], 0 }
   0x2   :  { %13 = vsyncpa [#allocation9], 0  ;;  %s33_s23 = sshll.u32 %s458_s1, 4  ;;  %s34_s23 = int_to_ptr.hbm [resolvable:$true] %s33_s23 }
   0x3   :  { %14 = vsyncpa [#allocation4], 0  ;;  %s375_s24 = smov [#allocation5]   ;;  %s19_s28 = sshll.u32 %s457_s0, 4  ;;  %s20_s28 = int_to_ptr.hbm [resolvable:$true] %s19_s28 }
   0x4   :  { %s35_s25 = sshll.u32 %s375_s24, 4  ;;  %s376_s29 = smov [#allocation2]   ;;  %s36_s25 = int_to_ptr.vmem [resolvable:$true] %s35_s25 }
   0x5   :  { %38 = dma.hbm_to_vmem [thread:$0]  %s34_s23, 16, %s36_s25, [#allocation6]  }
   0x6   :  { %s21_s30 = sshll.u32 %s376_s29, 4  ;;  %s377_s7 = smov 128   ;;  %s22_s30 = int_to_ptr.vmem [resolvable:$true] %s21_s30 }
   0x7   :  { %s378_s8 = smov 8   ;;  %s45_s10 = sshll.u32 %s460_s3, 4  ;;  %s46_s10 = int_to_ptr.hbm [resolvable:$true] %s45_s10 }
   0x8   :  { %27 = dma.hbm_to_vmem [thread:$0]  %s20_s28, 256, %s22_s30, [#allocation3], %s377_s7, %s377_s7, %s378_s8  }
   0x9   :  { %s379_s11 = smov [#allocation7]   ;;  %s60_s14 = sshll.u32 %s462_s5, 4  ;;  %s61_s14 = int_to_ptr.hbm [resolvable:$true] %s60_s14 }
   0xa   :  { %s47_s12 = sshll.u32 %s379_s11, 4  ;;  %s380_s15 = smov 64   ;;  %s48_s12 = int_to_ptr.vmem [resolvable:$true] %s47_s12 }
   0xb   :  { %s381_s16 = smov 4   ;;  %s382_s17 = smov [#allocation8]  }
   0xc   :  { %53 = dma.hbm_to_vmem [thread:$0]  %s46_s10, 256, %s48_s12, [#allocation6], %s380_s15, %s380_s15, %s381_s16  }
   0xd   :  { %s62_s18 = sshll.u32 %s382_s17, 4  ;;  %s63_s18 = int_to_ptr.vmem [resolvable:$true] %s62_s18 }
   0xe   :  { %68 = dma.hbm_to_vmem [thread:$0]  %s61_s14, 256, %s63_s18, [#allocation9], %s377_s7, %s377_s7, %s378_s8  }
   0xf   :  { %367 = dma.done.wait [#allocation3], 256  }
  0x10   :  { %368 = vsyncadd [#allocation3], 4294967040 }
  0x11   :  { %369 = dma.done.wait [#allocation6], 272  }
  0x12   :  { %370 = vsyncadd [#allocation6], 4294967024 }
  0x13   :  { %371 = dma.done.wait [#allocation9], 256  }
  0x14   :  { %372 = vsyncadd [#allocation9], 4294967040  ;;  %vm88_vm0 = vcmask 261120   ;;  %v86_v0 = vld [vmem:[#allocation2] sm:$0xff]  ;;  %v87_v2 = vld [vmem:[#allocation2 + $0x8] sm:$0xff]  ;;  %v383_v4 = vmov 32.0  }
  0x15   :  { %v89_v1 = vsel %vm88_vm0, %v86_v0, 0.0  ;;  %v92_v3 = vsel %vm88_vm0, %v87_v2, 0.0  ;;  %241 = vrcp.f32 %v383_v4  ;;  %v227_v21 = vld [vmem:[#allocation7 + $0x8] sm:$0xff]  ;;  %v226_v23 = vld [vmem:[#allocation7] sm:$0xff]  ;;  %v238_v42 = vld [vmem:[#allocation5] ss:$0 sm:$0xff] }
  0x16   :  { %90 = vadd.xlane.f32.xlu0 %v89_v1  ;;  %182 = vmatpush.bf16.msra.mxu0 %v227_v21  ;;  %v239_v47 = vld [vmem:[%s459_s2] ss:$0 sm:$0xff]  ;;  %v190_v54 = vld [vmem:[#allocation8] sm:$0xff]  ;;  %v191_v58 = vld [vmem:[#allocation8 + $0x8] sm:$0xff]  ;;  %s384_s21 = smov [#allocation10]   ;;  %s202_s24 = sshll.u32 %s463_s6, 4  ;;  %s203_s24 = int_to_ptr.hbm [resolvable:$true] %s202_s24 }
  0x17   :  { %v240_v52 = vld [vmem:[%s461_s4] ss:$0 sm:$0xff]  ;;  %s200_s2 = sshll.u32 %s384_s21, 4  ;;  %s201_s2 = int_to_ptr.vmem [resolvable:$true] %s200_s2 }
  0x1a   :  { %183 = vmatpush.bf16.msra.mxu0 %v226_v23 }
  0x1b   :  { %v242_v5 = vpop.eup %241 }
  0x1c   :  { %v96_v6 = vmul.f32 32.0, %v242_v5  ;;  %vm100_vm1 = vweird.f32 %v242_v5 }
  0x1e   :  { %93 = vadd.xlane.f32.xlu0 %v92_v3  ;;  %v97_v7 = vsub.f32 1.0, %v96_v6 }
  0x20   :  { %v98_v8 = vmul.f32 %v242_v5, %v97_v7 }
  0x22   :  { %v99_v9 = vadd.f32 %v242_v5, %v98_v8 }
  0x24   :  { %v101_v10 = vsel %vm100_vm1, %v242_v5, %v99_v9 }
  0x89   :  { %v91_v11 = vpop.xlane.xlu0 %90 }
  0x8a   :  { %v102_v12 = vmul.f32 %v101_v10, %v91_v11 }
  0x8c   :  { %v104_v13 = vsub.f32 %v86_v0, %v102_v12 }
  0x8e   :  { %v106_v14 = vmul.f32 %v104_v13, %v104_v13 }
  0x90   :  { %v108_v15 = vsel %vm88_vm0, %v106_v14, 0.0 }
  0x91   :  { %109 = vadd.xlane.f32.xlu1 %v108_v15  ;;  %v94_v16 = vpop.xlane.xlu0 %93 }
  0x92   :  { %v103_v17 = vmul.f32 %v101_v10, %v94_v16 }
  0x94   :  { %v105_v18 = vsub.f32 %v87_v2, %v103_v17 }
  0x96   :  { %v107_v19 = vmul.f32 %v105_v18, %v105_v18 }
  0x98   :  { %v111_v20 = vsel %vm88_vm0, %v107_v19, 0.0 }
  0x99   :  { %112 = vadd.xlane.f32.xlu1 %v111_v20 }
 0x104   :  { %v110_v22 = vpop.xlane.xlu1 %109 }
 0x105   :  { %v114_v24 = vmul.f32 %v110_v22, %v101_v10 }
 0x107   :  { %v116_v25 = vadd.f32 1e-05, %v114_v24 }
 0x109   :  { %243 = vrsqrt.f32 %v116_v25  ;;  %vm124_vm3 = vweird.f32 %v116_v25 }
 0x10c   :  { %v113_v26 = vpop.xlane.xlu1 %112 }
 0x10d   :  { %v115_v27 = vmul.f32 %v113_v26, %v101_v10 }
 0x10f   :  { %v244_v28 = vpop.eup %243  ;;  %v117_v29 = vadd.f32 1e-05, %v115_v27 }
 0x110   :  { %v119_v30 = vmul.f32 %v244_v28, %v116_v25  ;;  %vm125_vm2 = vweird.f32 %v244_v28 }
 0x111   :  { %245 = vrsqrt.f32 %v117_v29  ;;  %vm126_vm4 = vmor %vm124_vm3, %vm125_vm2  ;;  %vm134_vm6 = vweird.f32 %v117_v29 }
 0x112   :  { %v120_v31 = vmul.f32 %v244_v28, %v119_v30 }
 0x114   :  { %v121_v32 = vmul.f32 0.5, %v120_v31 }
 0x116   :  { %v122_v33 = vsub.f32 1.5, %v121_v32 }
 0x117   :  { %v246_v34 = vpop.eup %245 }
 0x118   :  { %v123_v35 = vmul.f32 %v244_v28, %v122_v33  ;;  %v129_v36 = vmul.f32 %v246_v34, %v117_v29  ;;  %vm135_vm5 = vweird.f32 %v246_v34 }
 0x119   :  { %vm136_vm7 = vmor %vm134_vm6, %vm135_vm5 }
 0x11a   :  { %v130_v37 = vmul.f32 %v246_v34, %v129_v36  ;;  %v127_v38 = vsel %vm126_vm4, %v244_v28, %v123_v35 }
 0x11b   :  { %v138_v41 = vmul.f32 %v127_v38, %v104_v13 }
 0x11c   :  { %v131_v39 = vmul.f32 0.5, %v130_v37 }
 0x11d   :  { %v144_v46 = vmul.f32 %v238_v42, %v138_v41 }
 0x11e   :  { %v132_v40 = vsub.f32 1.5, %v131_v39 }
 0x11f   :  { %v150_v49 = vadd.f32 %v239_v47, %v144_v46 }
 0x120   :  { %v133_v43 = vmul.f32 %v246_v34, %v132_v40 }
 0x122   :  { %v137_v44 = vsel %vm136_vm7, %v246_v34, %v133_v43 }
 0x123   :  { %v139_v45 = vmul.f32 %v137_v44, %v105_v18 }
 0x125   :  { %v145_v48 = vmul.f32 %v238_v42, %v139_v45 }
 0x127   :  { %v151_v50 = vadd.f32 %v239_v47, %v145_v48 }
 0x129   :  { %v152_v51 = vpack.c.bf16 %v151_v50, %v150_v49 }
 0x12b   :  { %225 = vmatmul.msk.bf16.vlgmr.msra.gmra.mxu0 %vm88_vm0, %v152_v51 }
 0x1a8   :  { %v185_v53 = vpop.f32.mrf.mxu0 }
 0x1a9   :  { %v186_v55 = vadd.f32 %v240_v52, %v185_v53 }
 0x1ab   :  { %v192_v56 = vmul.f32 %v190_v54, %v186_v55 }
 0x1ad   :  { %194 = vst.msk [vmem:[#allocation10] sm:$0xff] %vm88_vm0, %v192_v56 }
 0x1b0   :  { %v187_v57 = vpop.f32.mrf.mxu0 }
 0x1b1   :  { %v188_v59 = vadd.f32 %v240_v52, %v187_v57 }
 0x1b3   :  { %v193_v60 = vmul.f32 %v191_v58, %v188_v59 }
 0x1b5   :  { %195 = vst.msk [vmem:[#allocation10 + $0x8] sm:$0xff] %vm88_vm0, %v193_v60 }
 0x1b6   :  { %208 = dma.vmem_to_hbm [thread:$0]  %s201_s2, 256, %s203_s24, [#allocation4], %s377_s7, %s377_s7, %s378_s8  }
 0x1b7   :  { %373 = dma.done.wait [#allocation4], 256  }
 0x1b8   :  { %374 = vsyncadd [#allocation4], 4294967040 }
 0x1b9   :  { %213 = vsyncpa [#allocation3], 1 }
 0x1ba   :  { %214 = vsyncpa [#allocation6], 1 }
 0x1bb   :  { %215 = vsyncpa [#allocation9], 1 }
 0x1bc   :  { %216 = vsyncpa [#allocation4], 1 }

</bundles_post_ra>
